<compile_context>
chip_gen: v6e
topology: v6e:2x2x1
jax: 0.10.0
libtpu: 0.0.40
codegen_flags: <defaults>
</compile_context>

<pallas_src>
import jax
import jax.numpy as jnp
from jax.experimental import pallas as pl
from jax.experimental.pallas import tpu as pltpu

F_IN, H1, H2, F_OUT = 21, 64, 32, 4
F_PAD = 32            # fc1 contraction dim padded 21 -> 32; lane 21 carries the bias
TILE_B_MAX = 32768    # ~25 MiB of in-flight VMEM -> fits v7x's 64 MiB with headroom


def _round_up(n, m):
    return ((n + m - 1) // m) * m


def _choose_tile(batch, tile_b_max):
    """Near-equal batch tiles, multiple of 128, >=2 (even) grid steps when possible."""
    assert tile_b_max % 128 == 0 and tile_b_max >= 128, "tile_b_max must be a multiple of 128"
    b128 = _round_up(max(batch, 1), 128)
    n_tiles = -(-b128 // tile_b_max)
    if b128 > 128:
        # prefer an even number of steps so both v7x TensorCores stay busy
        n_tiles = _round_up(n_tiles, 2)
    tb = _round_up(-(-b128 // n_tiles), 128)
    assert tb % 128 == 0 and tb <= tile_b_max
    b_pad = _round_up(b128, tb)
    return tb, b_pad


def solitaire_kernel(x_ref, w1_ref, w2_ref, b2_ref, w3_ref, b3_ref, o_ref):
    # fc1 + relu: (H1, F_PAD)bf16 @ (F_PAD, TB)bf16 -> (H1, TB) f32 on the MXU.
    # b1 is folded into w1[:, F_IN]; x's lane F_IN is 1.0, so no bias add needed.
    h1 = jnp.maximum(
        jnp.dot(w1_ref[...], x_ref[...], preferred_element_type=jnp.float32), 0.0)
    # fc2 + relu
    h2 = jnp.dot(w2_ref[...], h1.astype(w2_ref.dtype),
                 preferred_element_type=jnp.float32)
    h2 = jnp.maximum(h2 + b2_ref[...], 0.0)
    # fc3 (no activation)
    out = jnp.dot(w3_ref[...], h2.astype(w3_ref.dtype),
                  preferred_element_type=jnp.float32)
    o_ref[...] = (out + b3_ref[...]).astype(o_ref.dtype)


def solitaire_forward(x, kparams, *, tile_b_max=TILE_B_MAX):
    """x: (B, 21) float32. kparams: prepare_params(...) output. Returns (B, 4) f32.

    Intended to be called under jax.jit so the pad/transpose/cast layout conversion
    fuses with the surrounding program instead of costing extra HBM passes.
    """
    B = x.shape[0]
    tb, b_pad = _choose_tile(B, tile_b_max)

    # Pad batch + features, set the bias lane (feature index F_IN) to 1.0, put the
    # batch on the 128-lane axis, cast to bf16 for the MXU.
    xp = jnp.pad(x, ((0, b_pad - B), (0, F_PAD - F_IN)))
    xp = xp.at[:, F_IN].set(1.0)
    xt = xp.T.astype(jnp.bfloat16)                       # (F_PAD, b_pad)

    out = pl.pallas_call(
        solitaire_kernel,
        out_shape=jax.ShapeDtypeStruct((F_OUT, b_pad), jnp.float32),
        grid=(b_pad // tb,),
        in_specs=[
            pl.BlockSpec((F_PAD, tb), lambda i: (0, i)),    # x tile   (pipelined)
            pl.BlockSpec((H1, F_PAD), lambda i: (0, 0)),    # w1 (+b1) (resident)
            pl.BlockSpec((H2, H1), lambda i: (0, 0)),       # w2
            pl.BlockSpec((H2, 1), lambda i: (0, 0)),        # b2
            pl.BlockSpec((F_OUT, H2), lambda i: (0, 0)),    # w3
            pl.BlockSpec((F_OUT, 1), lambda i: (0, 0)),     # b3
        ],
        out_specs=pl.BlockSpec((F_OUT, tb), lambda i: (0, i)),
        compiler_params=pltpu.CompilerParams(
            dimension_semantics=("parallel",),
            vmem_limit_bytes=48 * 1024 * 1024,
        ),
    )(xt, kparams["w1"], kparams["w2"], kparams["b2"], kparams["w3"], kparams["b3"])

    # Back to the (B, 4) row-major view the caller expects.
    return out[:, :B].T


def init_params(key):
    """Deterministic f32 params in torch nn.Linear orientation: W (out, in), b (out,)."""
    ks = jax.random.split(key, 6)

    def linear(kw, kb, fan_in, fan_out):
        bound = 1.0 / jnp.sqrt(float(fan_in))
        w = jax.random.uniform(kw, (fan_out, fan_in), jnp.float32, -bound, bound)
        b = jax.random.uniform(kb, (fan_out,), jnp.float32, -bound, bound)
        return w, b

    w1, b1 = linear(ks[0], ks[1], F_IN, H1)
    w2, b2 = linear(ks[2], ks[3], H1, H2)
    w3, b3 = linear(ks[4], ks[5], H2, F_OUT)
    return {"w1": w1, "b1": b1, "w2": w2, "b2": b2, "w3": w3, "b3": b3}


def prepare_params(p):
    """Kernel layout: fc1 input padded 21->F_PAD with b1 folded into column F_IN,
    weights bf16, remaining biases (out, 1) f32."""
    w1p = jnp.pad(p["w1"], ((0, 0), (0, F_PAD - F_IN)))
    w1p = w1p.at[:, F_IN].set(p["b1"])                    # bias rides the 1.0 lane
    return {
        "w1": w1p.astype(jnp.bfloat16),
        "w2": p["w2"].astype(jnp.bfloat16),
        "b2": p["b2"].reshape(H2, 1),
        "w3": p["w3"].astype(jnp.bfloat16),
        "b3": p["b3"].reshape(F_OUT, 1),
    }


def reference_forward(x, p):
    """Pure-JAX f32 reference matching the PyTorch module exactly."""
    h1 = jnp.maximum(x @ p["w1"].T + p["b1"], 0.0)
    h2 = jnp.maximum(h1 @ p["w2"].T + p["b2"], 0.0)
    return h2 @ p["w3"].T + p["b3"]


if __name__ == "__main__":
    key = jax.random.PRNGKey(0)
    k_x1, k_x2, k_p = jax.random.split(key, 3)

    params = init_params(k_p)
    kparams = prepare_params(params)
    forward = jax.jit(solitaire_forward)   # fuse pad/transpose/cast with the kernel

    # Small batch (single grid step).
    B1 = 8
    x1 = jax.random.normal(k_x1, (B1, F_IN), jnp.float32)
    out1 = jax.block_until_ready(forward(x1, kparams))
    ref1 = reference_forward(x1, params)
    assert out1.shape == (B1, F_OUT), out1.shape
    assert jnp.allclose(out1, ref1, atol=5e-2, rtol=5e-2), \
        f"mismatch, max_err={float(jnp.max(jnp.abs(out1 - ref1)))}"

    # Non-multiple-of-128 batch -> exercises multi-step grid + tail padding.
    B2 = 384 + 5
    x2 = jax.random.normal(k_x2, (B2, F_IN), jnp.float32)
    out2 = jax.block_until_ready(forward(x2, kparams))
    ref2 = reference_forward(x2, params)
    assert out2.shape == (B2, F_OUT), out2.shape
    assert jnp.allclose(out2, ref2, atol=5e-2, rtol=5e-2), \
        f"mismatch, max_err={float(jnp.max(jnp.abs(out2 - ref2)))}"

    print("KERNEL_OK")
</pallas_src>

<mosaic_0001>
module attributes {stable_mosaic.version = 11 : i64} {
  func.func @solitaire_kernel(%arg0: i32, %arg1: memref<32x128xbf16, #tpu.memory_space<vmem>>, %arg2: memref<64x32xbf16, #tpu.memory_space<vmem>>, %arg3: memref<32x64xbf16, #tpu.memory_space<vmem>>, %arg4: memref<32x1xf32, #tpu.memory_space<vmem>>, %arg5: memref<4x32xbf16, #tpu.memory_space<vmem>>, %arg6: memref<4x1xf32, #tpu.memory_space<vmem>>, %arg7: memref<4x128xf32, #tpu.memory_space<vmem>>) attributes {dimension_semantics = [#tpu.dimension_semantics<parallel>], iteration_bounds = array<i64: 1>, scalar_prefetch = 0 : i64, scratch_operands = 0 : i64, tpu.core_type = #tpu.core_type<tc>, window_params = [{transform_indices = @transform_0, window_bounds = array<i64: 32, 128>}, {pipeline_mode = #tpu.pipeline_mode<synchronous>, transform_indices = @transform_1, window_bounds = array<i64: 64, 32>}, {pipeline_mode = #tpu.pipeline_mode<synchronous>, transform_indices = @transform_2, window_bounds = array<i64: 32, 64>}, {pipeline_mode = #tpu.pipeline_mode<synchronous>, transform_indices = @transform_3, window_bounds = array<i64: 32, 1>}, {pipeline_mode = #tpu.pipeline_mode<synchronous>, transform_indices = @transform_4, window_bounds = array<i64: 4, 32>}, {pipeline_mode = #tpu.pipeline_mode<synchronous>, transform_indices = @transform_5, window_bounds = array<i64: 4, 1>}, {transform_indices = @transform_6, window_bounds = array<i64: 4, 128>}]} {
    %c0 = arith.constant 0 : index
    %c0_0 = arith.constant 0 : index
    %0 = vector.load %arg2[%c0, %c0_0] : memref<64x32xbf16, #tpu.memory_space<vmem>>, vector<64x32xbf16>
    %c0_1 = arith.constant 0 : index
    %c0_2 = arith.constant 0 : index
    %1 = vector.load %arg1[%c0_1, %c0_2] : memref<32x128xbf16, #tpu.memory_space<vmem>>, vector<32x128xbf16>
    %cst = arith.constant dense<0.000000e+00> : vector<64x128xf32>
    %2 = tpu.matmul %0, %1, %cst {dimension_numbers = #tpu.dot_dimension_numbers<[1], [0], [0], [1], [0, 0, 1, 1], [], []>} : vector<64x32xbf16>, vector<32x128xbf16>, vector<64x128xf32> -> vector<64x128xf32>
    %cst_3 = arith.constant 0.000000e+00 : f32
    %3 = vector.broadcast %cst_3 : f32 to vector<64x128xf32>
    %4 = arith.maximumf %2, %3 : vector<64x128xf32>
    %c0_4 = arith.constant 0 : index
    %c0_5 = arith.constant 0 : index
    %5 = vector.load %arg3[%c0_4, %c0_5] : memref<32x64xbf16, #tpu.memory_space<vmem>>, vector<32x64xbf16>
    %6 = arith.truncf %4 : vector<64x128xf32> to vector<64x128xbf16>
    %cst_6 = arith.constant dense<0.000000e+00> : vector<32x128xf32>
    %7 = tpu.matmul %5, %6, %cst_6 {dimension_numbers = #tpu.dot_dimension_numbers<[1], [0], [0], [1], [0, 0, 1, 1], [], []>} : vector<32x64xbf16>, vector<64x128xbf16>, vector<32x128xf32> -> vector<32x128xf32>
    %c0_7 = arith.constant 0 : index
    %c0_8 = arith.constant 0 : index
    %8 = vector.load %arg4[%c0_7, %c0_8] : memref<32x1xf32, #tpu.memory_space<vmem>>, vector<32x1xf32>
    %9 = vector.broadcast %8 : vector<32x1xf32> to vector<32x128xf32>
    %10 = arith.addf %7, %9 : vector<32x128xf32>
    %cst_9 = arith.constant 0.000000e+00 : f32
    %11 = vector.broadcast %cst_9 : f32 to vector<32x128xf32>
    %12 = arith.maximumf %10, %11 : vector<32x128xf32>
    %c0_10 = arith.constant 0 : index
    %c0_11 = arith.constant 0 : index
    %13 = vector.load %arg5[%c0_10, %c0_11] : memref<4x32xbf16, #tpu.memory_space<vmem>>, vector<4x32xbf16>
    %14 = arith.truncf %12 : vector<32x128xf32> to vector<32x128xbf16>
    %cst_12 = arith.constant dense<0.000000e+00> : vector<4x128xf32>
    %15 = tpu.matmul %13, %14, %cst_12 {dimension_numbers = #tpu.dot_dimension_numbers<[1], [0], [0], [1], [0, 0, 1, 1], [], []>} : vector<4x32xbf16>, vector<32x128xbf16>, vector<4x128xf32> -> vector<4x128xf32>
    %c0_13 = arith.constant 0 : index
    %c0_14 = arith.constant 0 : index
    %16 = vector.load %arg6[%c0_13, %c0_14] : memref<4x1xf32, #tpu.memory_space<vmem>>, vector<4x1xf32>
    %17 = vector.broadcast %16 : vector<4x1xf32> to vector<4x128xf32>
    %18 = arith.addf %15, %17 : vector<4x128xf32>
    %c0_15 = arith.constant 0 : index
    %c0_16 = arith.constant 0 : index
    %19 = vector.load %arg7[%c0_15, %c0_16] : memref<4x128xf32, #tpu.memory_space<vmem>>, vector<4x128xf32>
    tpu.vector_store %arg7[%c0_15, %c0_16], %18 {strides = array<i32>} : memref<4x128xf32, #tpu.memory_space<vmem>>, vector<4x128xf32>,
    return
  }
  func.func @transform_0(%arg0: i32) -> (i32, i32) {
    %c0_i32 = arith.constant 0 : i32
    %c0_i32_0 = arith.constant 0 : i32
    return %c0_i32, %arg0 : i32, i32
  }
  func.func @transform_1(%arg0: i32) -> (i32, i32) {
    %c0_i32 = arith.constant 0 : i32
    %c0_i32_0 = arith.constant 0 : i32
    %c0_i32_1 = arith.constant 0 : i32
    return %c0_i32, %c0_i32_0 : i32, i32
  }
  func.func @transform_2(%arg0: i32) -> (i32, i32) {
    %c0_i32 = arith.constant 0 : i32
    %c0_i32_0 = arith.constant 0 : i32
    %c0_i32_1 = arith.constant 0 : i32
    return %c0_i32, %c0_i32_0 : i32, i32
  }
  func.func @transform_3(%arg0: i32) -> (i32, i32) {
    %c0_i32 = arith.constant 0 : i32
    %c0_i32_0 = arith.constant 0 : i32
    %c0_i32_1 = arith.constant 0 : i32
    return %c0_i32, %c0_i32_0 : i32, i32
  }
  func.func @transform_4(%arg0: i32) -> (i32, i32) {
    %c0_i32 = arith.constant 0 : i32
    %c0_i32_0 = arith.constant 0 : i32
    %c0_i32_1 = arith.constant 0 : i32
    return %c0_i32, %c0_i32_0 : i32, i32
  }
  func.func @transform_5(%arg0: i32) -> (i32, i32) {
    %c0_i32 = arith.constant 0 : i32
    %c0_i32_0 = arith.constant 0 : i32
    %c0_i32_1 = arith.constant 0 : i32
    return %c0_i32, %c0_i32_0 : i32, i32
  }
  func.func @transform_6(%arg0: i32) -> (i32, i32) {
    %c0_i32 = arith.constant 0 : i32
    %c0_i32_0 = arith.constant 0 : i32
    return %c0_i32, %arg0 : i32, i32
  }
}

</mosaic_0001>

<bundles_post_ra>
// kernel: solitaire_forward.1
= control target key start
LH: loop header
LB: loop body
LE: loop exit
PB: predicated region body
PF: predicated region fallthrough
CT: control target
= control target key end

     0   :  { %vm68_vm0 = vcmask 261120   ;;  %vm196_vm1 = vcmask 523264   ;;  %v388_v7 = vmov 0   ;;  %v389_v34 = vmov 0.0   ;;  %s478_s0 = inlined_call_operand.vmem [shape: bf16[32,128], index: 0, kind: input, shape index: {}]   ;;  %s479_s1 = inlined_call_operand.vmem [shape: bf16[64,32], index: 1, kind: input, shape index: {}]   ;;  %s480_s2 = inlined_call_operand.vmem [shape: bf16[32,64], index: 2, kind: input, shape index: {}]   ;;  %s481_s3 = inlined_call_operand.vmem [shape: f32[32,1], index: 3, kind: input, shape index: {}]   ;;  %s482_s5 = inlined_call_operand.vmem [shape: f32[4,1], index: 5, kind: input, shape index: {}]   ;;  %s483_s4 = inlined_call_operand.vmem [shape: bf16[4,32], index: 4, kind: input, shape index: {}]   ;;  %s484_s6 = inlined_call_operand.vmem [shape: f32[4,128], index: 6, kind: output, shape index: {}]  }
   0x1   :  { %v380_v0 = vld [vmem:[%s478_s0 + $0x8] sm:$0xff]   ;;  %v381_v1 = vld [vmem:[%s478_s0] sm:$0xff]   ;;  %v384_v4 = vld [vmem:[%s479_s1 + $0x10] sm:$0xff]   ;;  %378 = vset.pattern.permute.xlu0 %v388_v7  ;;  %379 = vset.pattern.permute.xlu1 %v388_v7  ;;  %vm390_vm2 = vmmov 0  }
   0x2   :  { %343 = vmatprep.subr.bf16.mxu0 %v380_v0  ;;  %v382_v2 = vld [vmem:[%s479_s1] sm:$0xff]   ;;  %v383_v3 = vld [vmem:[%s479_s1 + $0x8] sm:$0xff]   ;;  %v385_v5 = vld [vmem:[%s479_s1 + $0x18] sm:$0xff]  }
   0x3   :  { %344 = vmatpush3.bf16.msra.mxu0 %v380_v0  ;;  %347 = vmatprep.mubr.msk.bf16.mxu0 %vm68_vm0, %v382_v2  ;;  %v386_v6 = vld [vmem:[%s480_s2] sm:$0xff]   ;;  %v164_v8 = vld [vmem:[%s481_s3 + $0x10] sm:$0xff]  ;;  %v165_v10 = vld [vmem:[%s481_s3 + $0x18] sm:$0xff] }
   0x4   :  { %345 = vmatprep.subr.bf16.mxu0 %v381_v1  ;;  %363 = vmatprep.mubr.msk.bf16.mxu1 %vm196_vm1, %v386_v6  ;;  %v162_v9 = vld [vmem:[%s481_s3] sm:$0xff]  ;;  %v163_v11 = vld [vmem:[%s481_s3 + $0x8] sm:$0xff] }
   0x5   :  { %178 = vperm.xlu0 %378, %v164_v8   ;;  %168 = vperm.xlu1 %379, %v162_v9   ;;  %v259_v12 = vld [vmem:[%s482_s5] sm:$0xf]  ;;  %v387_v33 = vld [vmem:[%s480_s2 + $0x8] sm:$0xff]  }
   0x6   :  { %v256_v53 = vld [vmem:[%s483_s4] sm:$0x3] }
   0x7   :  { %346 = vmatpush3.bf16.msra.mxu0 %v381_v1 }
   0x8   :  { %367 = vmatprep.subr.bf16.mxu0 %v389_v34 }
   0x9   :  { %183 = vperm.xlu0 %378, %v165_v10   ;;  %173 = vperm.xlu1 %379, %v163_v11  }
   0xa   :  { %348 = vmatmul.mubr.msk.bf16.vlgmr.msra.gmra.mxu0 %vm68_vm0, %v383_v3 }
   0xb   :  { %351 = vmatprep.mubr.msk.bf16.mxu0 %vm68_vm0, %v384_v4 }
   0xd   :  { %262 = vperm.xlu0 %378, %v259_v12  }
  0x12   :  { %352 = vmatmul.mubr.msk.bf16.gmra.mxu0 %vm68_vm0, %v385_v5 }
  0x13   :  { %371 = vmatprep.mubr.msk.bf16.mxu0 %vm390_vm2, %v389_v34 }
  0x80   :  { %v179_v35 = vpop.permute.xlu0 %178  ;;  %v169_v37 = vpop.permute.xlu1 %168 }
  0x84   :  { %v184_v40 = vpop.permute.xlu0 %183  ;;  %v174_v43 = vpop.permute.xlu1 %173 }
  0x88   :  { %v263_v54 = vpop.permute.xlu0 %262 }
  0xca   :  { %v349_v13 = vpop.f32.mrf.mxu0 }
  0xcb   :  { %v148_v28 = vmax.f32 %v349_v13, 0.0 }
  0xcc   :  { %v115_v14 = vpop.f32.mrf.mxu0 }
  0xcd   :  { %v146_v31 = vmax.f32 %v115_v14, 0.0 }
  0xce   :  { %v350_v15 = vpop.f32.mrf.mxu0 }
  0xcf   :  { %v149_v26 = vmax.f32 %v350_v15, 0.0 }
  0xd0   :  { %v118_v16 = vpop.f32.mrf.mxu0 }
  0xd1   :  { %v159_v29 = vpack.c.bf16 %v149_v26, %v148_v28  ;;  %v147_v30 = vmax.f32 %v118_v16, 0.0 }
  0xd2   :  { %v353_v17 = vpop.f32.mrf.mxu0 }
  0xd3   :  { %v152_v20 = vmax.f32 %v353_v17, 0.0  ;;  %v158_v32 = vpack.c.bf16 %v147_v30, %v146_v31 }
  0xd4   :  { %v131_v18 = vpop.f32.mrf.mxu0 }
  0xd5   :  { %v150_v23 = vmax.f32 %v131_v18, 0.0 }
  0xd6   :  { %v354_v19 = vpop.f32.mrf.mxu0 }
  0xd7   :  { %v153_v21 = vmax.f32 %v354_v19, 0.0 }
  0xd8   :  { %v134_v22 = vpop.f32.mrf.mxu0 }
  0xd9   :  { %v151_v24 = vmax.f32 %v134_v22, 0.0  ;;  %v161_v25 = vpack.c.bf16 %v153_v21, %v152_v20 }
  0xdb   :  { %v160_v27 = vpack.c.bf16 %v151_v24, %v150_v23  ;;  %355 = vmatprep.subr.bf16.mxu1 %v161_v25 }
  0xdc   :  { %356 = vmatpush3.bf16.msra.mxu1 %v161_v25 }
  0xdd   :  { %357 = vmatprep.subr.bf16.mxu1 %v160_v27 }
  0xe0   :  { %358 = vmatpush3.bf16.msra.mxu1 %v160_v27 }
  0xe1   :  { %359 = vmatprep.subr.bf16.mxu1 %v159_v29 }
  0xe4   :  { %360 = vmatpush3.bf16.msra.mxu1 %v159_v29 }
  0xe5   :  { %361 = vmatprep.subr.bf16.mxu1 %v158_v32 }
  0xe8   :  { %362 = vmatpush3.bf16.msra.mxu1 %v158_v32 }
  0xeb   :  { %364 = vmatmul.mubr.msk.bf16.vlgmr.msra.gmra.mxu1 %vm196_vm1, %v387_v33 }
 0x1ab   :  { %v365_v36 = vpop.f32.mrf.mxu1 }
 0x1ac   :  { %v246_v39 = vadd.f32 %v365_v36, %v179_v35 }
 0x1ad   :  { %v237_v38 = vpop.f32.mrf.mxu1 }
 0x1ae   :  { %v254_v45 = vmax.f32 %v246_v39, 0.0  ;;  %v238_v46 = vadd.f32 %v237_v38, %v169_v37 }
 0x1af   :  { %v366_v41 = vpop.f32.mrf.mxu1 }
 0x1b0   :  { %v249_v42 = vadd.f32 %v366_v41, %v184_v40  ;;  %v252_v51 = vmax.f32 %v238_v46, 0.0 }
 0x1b1   :  { %v240_v44 = vpop.f32.mrf.mxu1 }
 0x1b2   :  { %v255_v47 = vmax.f32 %v249_v42, 0.0  ;;  %v241_v48 = vadd.f32 %v240_v44, %v174_v43 }
 0x1b4   :  { %v258_v49 = vpack.c.bf16 %v255_v47, %v254_v45  ;;  %v253_v50 = vmax.f32 %v241_v48, 0.0 }
 0x1b6   :  { %368 = vmatpush3.bf16.msra.mxu0 %v258_v49  ;;  %v257_v52 = vpack.c.bf16 %v253_v50, %v252_v51 }
 0x1b7   :  { %369 = vmatprep.subr.bf16.mxu0 %v389_v34 }
 0x1ba   :  { %370 = vmatpush3.bf16.msra.mxu0 %v257_v52 }
 0x1bd   :  { %372 = vmatmul.mubr.msk.bf16.vlgmr.msra.gmra.mxu0 %vm68_vm0, %v256_v53 }
 0x27d   :  { %v302_v55 = vpop.f32.mrf.mxu0 }
 0x27e   :  { %v303_v56 = vadd.f32 %v302_v55, %v263_v54 }
 0x27f   :  { %v373_v57 = vpop.f32.mrf.mxu0 }
 0x280   :  { %308 = vst [vmem:[%s484_s6] sm:$0xf] %v303_v56 }
 0x281   :  { %v305_v58 = vpop.f32.mrf.mxu0 }
 0x283   :  { %v374_v59 = vpop.f32.mrf.mxu0 }

</bundles_post_ra>
